<compile_context>
chip_gen: v7x
topology: tpu7x:2x2x1
jax: 0.10.0
libtpu: 0.0.40
codegen_flags: <defaults>
</compile_context>

<pallas_src>
import functools
import math

import jax
import jax.numpy as jnp
from jax.experimental import pallas as pl
from jax.experimental.pallas import tpu as pltpu


def _cond_layernorm_kernel(x_ref, ctx_ref, wg_ref, bg_ref, wb_ref, bb_ref,
                           o_ref, *, eps):
    # Conditioning parameters: weights arrive pre-transposed ([C, H]), so no
    # per-step transpose; matmuls stay in the native dtype, f32 accumulation.
    ctx = ctx_ref[...][0]                                      # [1, C]
    gamma = (jnp.dot(ctx, wg_ref[...],
                     preferred_element_type=jnp.float32)[:, None, :]
             + bg_ref[...])                                    # [1, 1, H] f32
    beta = (jnp.dot(ctx, wb_ref[...],
                    preferred_element_type=jnp.float32)[:, None, :]
            + bb_ref[...])                                     # [1, 1, H] f32

    # LayerNorm statistics in f32, single fused reduction pass.
    x = x_ref[...].astype(jnp.float32)                         # [1, TS, H]
    inv_h = 1.0 / x.shape[-1]
    mean = jnp.sum(x, axis=-1, keepdims=True) * inv_h
    ex2 = jnp.sum(x * x, axis=-1, keepdims=True) * inv_h
    var = jnp.maximum(ex2 - mean * mean, 0.0)
    x_norm = (x - mean) * jax.lax.rsqrt(var + eps)

    o_ref[...] = (gamma * x_norm + beta).astype(o_ref.dtype)


def init_conditional_layernorm_params(hidden_dim, context_dim, seed=0):
    """Mirror the PyTorch _init_weights final state: gamma_net weight/bias end
    up zeroed (the second zeros_ overwrites the ones_); beta_net keeps the
    default nn.Linear init (uniform +/- 1/sqrt(fan_in))."""
    key = jax.random.PRNGKey(seed)
    kw, kb = jax.random.split(key)
    bound = 1.0 / math.sqrt(context_dim)
    return {
        "gamma_w": jnp.zeros((hidden_dim, context_dim), jnp.float32),
        "gamma_b": jnp.zeros((hidden_dim,), jnp.float32),
        "beta_w": jax.random.uniform(kw, (hidden_dim, context_dim),
                                     jnp.float32, -bound, bound),
        "beta_b": jax.random.uniform(kb, (hidden_dim,), jnp.float32,
                                     -bound, bound),
    }


def conditional_layer_norm(x, context, params, eps=1e-5):
    """x: [batch, seq, hidden], context: [batch, context_dim] -> [B, S, H]."""
    B, S, H = x.shape
    Bc, C = context.shape
    if Bc != B:
        raise ValueError("batch mismatch between x and context")

    # Large seq tiles amortize per-step overhead; ragged last tile is handled
    # by pl.cdiv + masked OOB writes (no wrapper-side padding / slicing).
    TS = S if S <= 512 else 512
    grid = (B, pl.cdiv(S, TS))

    ctx3 = context.reshape(B, 1, C)
    wg_t = jnp.transpose(params["gamma_w"])                    # [C, H]
    wb_t = jnp.transpose(params["beta_w"])                     # [C, H]
    bg = params["gamma_b"].reshape(1, 1, H).astype(jnp.float32)
    bb = params["beta_b"].reshape(1, 1, H).astype(jnp.float32)

    x_spec = pl.BlockSpec((1, TS, H), lambda b, s: (b, s, 0))
    ctx_spec = pl.BlockSpec((1, 1, C), lambda b, s: (b, 0, 0))
    w_spec = pl.BlockSpec((C, H), lambda b, s: (0, 0))
    bias_spec = pl.BlockSpec((1, 1, H), lambda b, s: (0, 0, 0))

    # Explicit VMEM budget (x in + out double-buffered, plus resident
    # conditioning weights/biases), clamped to stay portable on v5e..v7x.
    x_item = jnp.dtype(x.dtype).itemsize
    w_item = jnp.dtype(params["gamma_w"].dtype).itemsize
    est = (4 * TS * H * x_item            # x + out, double buffered
           + 2 * C * x_item               # context
           + 4 * C * H * w_item           # both projection weights
           + 4 * H * 4)                   # both f32 biases
    vmem_limit = int(min(max(2 * est, 32 << 20), 64 << 20))

    kernel = functools.partial(_cond_layernorm_kernel, eps=eps)

    out = pl.pallas_call(
        kernel,
        out_shape=jax.ShapeDtypeStruct((B, S, H), x.dtype),
        grid_spec=pltpu.PrefetchScalarGridSpec(
            num_scalar_prefetch=0,
            grid=grid,
            in_specs=[x_spec, ctx_spec, w_spec, bias_spec, w_spec, bias_spec],
            out_specs=x_spec,
        ),
        compiler_params=pltpu.CompilerParams(
            dimension_semantics=("parallel", "parallel"),
            vmem_limit_bytes=vmem_limit),
    )(x, ctx3, wg_t, bg, wb_t, bb)
    return out


def _reference(x, context, params, eps=1e-5):
    """Pure-JAX reference mirroring the PyTorch forward."""
    mean = jnp.mean(x, axis=-1, keepdims=True)
    var = jnp.mean(jnp.square(x - mean), axis=-1, keepdims=True)
    x_norm = (x - mean) / jnp.sqrt(var + eps)
    gamma = context @ params["gamma_w"].T + params["gamma_b"]
    beta = context @ params["beta_w"].T + params["beta_b"]
    return gamma[:, None, :] * x_norm + beta[:, None, :]


if __name__ == "__main__":
    B, S, H, C = 2, 8, 32, 8

    key = jax.random.PRNGKey(0)
    kx, kc, kw1, kb1, kw2, kb2 = jax.random.split(key, 6)
    x = jax.random.normal(kx, (B, S, H), jnp.float32)
    context = jax.random.normal(kc, (B, C), jnp.float32)

    # Case 1: params mirroring the PyTorch module's _init_weights.
    params_init = init_conditional_layernorm_params(H, C, seed=0)

    # Case 2: fully random params to exercise the gamma path non-trivially.
    bound = 1.0 / math.sqrt(C)
    params_rand = {
        "gamma_w": jax.random.uniform(kw1, (H, C), jnp.float32, -bound, bound),
        "gamma_b": jax.random.uniform(kb1, (H,), jnp.float32, -bound, bound),
        "beta_w": jax.random.uniform(kw2, (H, C), jnp.float32, -bound, bound),
        "beta_b": jax.random.uniform(kb2, (H,), jnp.float32, -bound, bound),
    }

    for params in (params_init, params_rand):
        out = conditional_layer_norm(x, context, params)
        jax.block_until_ready(out)
        ref = _reference(x, context, params)
        assert jnp.allclose(out, ref, atol=1e-4, rtol=1e-4)

    print("KERNEL_OK")
</pallas_src>

<mosaic_0001>
module attributes {stable_mosaic.version = 11 : i64} {
  func.func @_cond_layernorm_kernel(%arg0: i32, %arg1: i32, %arg2: memref<1x8x32xf32, #tpu.memory_space<vmem>>, %arg3: memref<1x1x8xf32, #tpu.memory_space<vmem>>, %arg4: memref<8x32xf32, #tpu.memory_space<vmem>>, %arg5: memref<1x1x32xf32, #tpu.memory_space<vmem>>, %arg6: memref<8x32xf32, #tpu.memory_space<vmem>>, %arg7: memref<1x1x32xf32, #tpu.memory_space<vmem>>, %arg8: memref<1x8x32xf32, #tpu.memory_space<vmem>>) attributes {dimension_semantics = [#tpu.dimension_semantics<parallel>, #tpu.dimension_semantics<parallel>], iteration_bounds = array<i64: 2, 1>, scalar_prefetch = 0 : i64, scratch_operands = 0 : i64, tpu.core_type = #tpu.core_type<tc>, window_params = [{transform_indices = @transform_0, window_bounds = array<i64: 1, 8, 32>}, {transform_indices = @transform_1, window_bounds = array<i64: 1, 1, 8>}, {pipeline_mode = #tpu.pipeline_mode<synchronous>, transform_indices = @transform_2, window_bounds = array<i64: 8, 32>}, {pipeline_mode = #tpu.pipeline_mode<synchronous>, transform_indices = @transform_3, window_bounds = array<i64: 1, 1, 32>}, {pipeline_mode = #tpu.pipeline_mode<synchronous>, transform_indices = @transform_4, window_bounds = array<i64: 8, 32>}, {pipeline_mode = #tpu.pipeline_mode<synchronous>, transform_indices = @transform_5, window_bounds = array<i64: 1, 1, 32>}, {transform_indices = @transform_6, window_bounds = array<i64: 1, 8, 32>}]} {
    %c0 = arith.constant 0 : index
    %c0_0 = arith.constant 0 : index
    %c0_1 = arith.constant 0 : index
    %0 = vector.load %arg3[%c0, %c0_0, %c0_1] : memref<1x1x8xf32, #tpu.memory_space<vmem>>, vector<1x1x8xf32>
    %1 = vector.shape_cast %0 : vector<1x1x8xf32> to vector<1x8xf32>
    %c0_2 = arith.constant 0 : index
    %c0_3 = arith.constant 0 : index
    %2 = vector.load %arg4[%c0_2, %c0_3] : memref<8x32xf32, #tpu.memory_space<vmem>>, vector<8x32xf32>
    %cst = arith.constant dense<0.000000e+00> : vector<1x32xf32>
    %3 = tpu.matmul %1, %2, %cst {dimension_numbers = #tpu.dot_dimension_numbers<[1], [0], [0], [1], [0, 0, 1, 1], [], []>} : vector<1x8xf32>, vector<8x32xf32>, vector<1x32xf32> -> vector<1x32xf32>
    %4 = vector.shape_cast %3 : vector<1x32xf32> to vector<1x1x32xf32>
    %c0_4 = arith.constant 0 : index
    %c0_5 = arith.constant 0 : index
    %c0_6 = arith.constant 0 : index
    %5 = vector.load %arg5[%c0_4, %c0_5, %c0_6] : memref<1x1x32xf32, #tpu.memory_space<vmem>>, vector<1x1x32xf32>
    %6 = arith.addf %4, %5 : vector<1x1x32xf32>
    %c0_7 = arith.constant 0 : index
    %c0_8 = arith.constant 0 : index
    %7 = vector.load %arg6[%c0_7, %c0_8] : memref<8x32xf32, #tpu.memory_space<vmem>>, vector<8x32xf32>
    %cst_9 = arith.constant dense<0.000000e+00> : vector<1x32xf32>
    %8 = tpu.matmul %1, %7, %cst_9 {dimension_numbers = #tpu.dot_dimension_numbers<[1], [0], [0], [1], [0, 0, 1, 1], [], []>} : vector<1x8xf32>, vector<8x32xf32>, vector<1x32xf32> -> vector<1x32xf32>
    %9 = vector.shape_cast %8 : vector<1x32xf32> to vector<1x1x32xf32>
    %c0_10 = arith.constant 0 : index
    %c0_11 = arith.constant 0 : index
    %c0_12 = arith.constant 0 : index
    %10 = vector.load %arg7[%c0_10, %c0_11, %c0_12] : memref<1x1x32xf32, #tpu.memory_space<vmem>>, vector<1x1x32xf32>
    %11 = arith.addf %9, %10 : vector<1x1x32xf32>
    %c0_13 = arith.constant 0 : index
    %c0_14 = arith.constant 0 : index
    %c0_15 = arith.constant 0 : index
    %12 = vector.load %arg2[%c0_13, %c0_14, %c0_15] : memref<1x8x32xf32, #tpu.memory_space<vmem>>, vector<1x8x32xf32>
    %cst_16 = arith.constant dense<0.000000e+00> : vector<1x8xf32>
    %13 = vector.multi_reduction <add>, %12, %cst_16 [2] : vector<1x8x32xf32> to vector<1x8xf32>
    %14 = vector.shape_cast %13 : vector<1x8xf32> to vector<1x8x1xf32>
    %cst_17 = arith.constant 3.125000e-02 : f32
    %15 = vector.broadcast %cst_17 : f32 to vector<1x8x1xf32>
    %16 = arith.mulf %14, %15 : vector<1x8x1xf32>
    %17 = arith.mulf %12, %12 : vector<1x8x32xf32>
    %cst_18 = arith.constant dense<0.000000e+00> : vector<1x8xf32>
    %18 = vector.multi_reduction <add>, %17, %cst_18 [2] : vector<1x8x32xf32> to vector<1x8xf32>
    %19 = vector.shape_cast %18 : vector<1x8xf32> to vector<1x8x1xf32>
    %cst_19 = arith.constant 3.125000e-02 : f32
    %20 = vector.broadcast %cst_19 : f32 to vector<1x8x1xf32>
    %21 = arith.mulf %19, %20 : vector<1x8x1xf32>
    %22 = arith.mulf %16, %16 : vector<1x8x1xf32>
    %23 = arith.subf %21, %22 : vector<1x8x1xf32>
    %cst_20 = arith.constant 0.000000e+00 : f32
    %24 = vector.broadcast %cst_20 : f32 to vector<1x8x1xf32>
    %25 = arith.maximumf %23, %24 : vector<1x8x1xf32>
    %26 = vector.broadcast %16 : vector<1x8x1xf32> to vector<1x8x32xf32>
    %27 = arith.subf %12, %26 : vector<1x8x32xf32>
    %cst_21 = arith.constant 9.99999974E-6 : f32
    %28 = vector.broadcast %cst_21 : f32 to vector<1x8x1xf32>
    %29 = arith.addf %25, %28 : vector<1x8x1xf32>
    %30 = math.rsqrt %29 : vector<1x8x1xf32>
    %31 = vector.broadcast %30 : vector<1x8x1xf32> to vector<1x8x32xf32>
    %32 = arith.mulf %27, %31 : vector<1x8x32xf32>
    %33 = vector.broadcast %6 : vector<1x1x32xf32> to vector<1x8x32xf32>
    %34 = arith.mulf %33, %32 : vector<1x8x32xf32>
    %35 = vector.broadcast %11 : vector<1x1x32xf32> to vector<1x8x32xf32>
    %36 = arith.addf %34, %35 : vector<1x8x32xf32>
    %c0_22 = arith.constant 0 : index
    %c0_23 = arith.constant 0 : index
    %c0_24 = arith.constant 0 : index
    %37 = vector.load %arg8[%c0_22, %c0_23, %c0_24] : memref<1x8x32xf32, #tpu.memory_space<vmem>>, vector<1x8x32xf32>
    tpu.vector_store %arg8[%c0_22, %c0_23, %c0_24], %36 {strides = array<i32>} : memref<1x8x32xf32, #tpu.memory_space<vmem>>, vector<1x8x32xf32>,
    return
  }
  func.func @transform_0(%arg0: i32, %arg1: i32) -> (i32, i32, i32) {
    %c0_i32 = arith.constant 0 : i32
    %c0_i32_0 = arith.constant 0 : i32
    return %arg0, %arg1, %c0_i32 : i32, i32, i32
  }
  func.func @transform_1(%arg0: i32, %arg1: i32) -> (i32, i32, i32) {
    %c0_i32 = arith.constant 0 : i32
    %c0_i32_0 = arith.constant 0 : i32
    %c0_i32_1 = arith.constant 0 : i32
    return %arg0, %c0_i32, %c0_i32_0 : i32, i32, i32
  }
  func.func @transform_2(%arg0: i32, %arg1: i32) -> (i32, i32) {
    %c0_i32 = arith.constant 0 : i32
    %c0_i32_0 = arith.constant 0 : i32
    %c0_i32_1 = arith.constant 0 : i32
    return %c0_i32, %c0_i32_0 : i32, i32
  }
  func.func @transform_3(%arg0: i32, %arg1: i32) -> (i32, i32, i32) {
    %c0_i32 = arith.constant 0 : i32
    %c0_i32_0 = arith.constant 0 : i32
    %c0_i32_1 = arith.constant 0 : i32
    %c0_i32_2 = arith.constant 0 : i32
    return %c0_i32, %c0_i32_0, %c0_i32_1 : i32, i32, i32
  }
  func.func @transform_4(%arg0: i32, %arg1: i32) -> (i32, i32) {
    %c0_i32 = arith.constant 0 : i32
    %c0_i32_0 = arith.constant 0 : i32
    %c0_i32_1 = arith.constant 0 : i32
    return %c0_i32, %c0_i32_0 : i32, i32
  }
  func.func @transform_5(%arg0: i32, %arg1: i32) -> (i32, i32, i32) {
    %c0_i32 = arith.constant 0 : i32
    %c0_i32_0 = arith.constant 0 : i32
    %c0_i32_1 = arith.constant 0 : i32
    %c0_i32_2 = arith.constant 0 : i32
    return %c0_i32, %c0_i32_0, %c0_i32_1 : i32, i32, i32
  }
  func.func @transform_6(%arg0: i32, %arg1: i32) -> (i32, i32, i32) {
    %c0_i32 = arith.constant 0 : i32
    %c0_i32_0 = arith.constant 0 : i32
    return %arg0, %arg1, %c0_i32 : i32, i32, i32
  }
}

</mosaic_0001>

<bundles_post_ra>
// kernel: tpu_custom_call.1
= control target key start
LH: loop header
LB: loop body
LE: loop exit
PB: predicated region body
PF: predicated region fallthrough
CT: control target
= control target key end

     0   :  { %11 = vsyncpa [#allocation3], 0  ;;  %s1136_s0 = inlined_call_operand.hbm [shape: f32[2,8,32], index: 0, kind: input, shape index: {}]   ;;  %s1137_s1 = inlined_call_operand.vmem [shape: f32[2,1,8], index: 1, kind: input, shape index: {}]   ;;  %s1138_s2 = inlined_call_operand.hbm [shape: f32[8,32], index: 2, kind: input, shape index: {}]   ;;  %s1139_s3 = inlined_call_operand.vmem [shape: f32[1,1,32], index: 3, kind: input, shape index: {}]   ;;  %s1140_s4 = inlined_call_operand.vmem [shape: f32[8,32], index: 4, kind: input, shape index: {}]   ;;  %s1141_s5 = inlined_call_operand.vmem [shape: f32[1,1,32], index: 5, kind: input, shape index: {}]   ;;  %s1142_s6 = inlined_call_operand.hbm [shape: f32[2,8,32], index: 6, kind: output, shape index: {}]  }
   0x1   :  { %13 = vsyncpa [#allocation3 + $0x1], 0 }
   0x2   :  { %14 = vsyncpa [#allocation6], 0 }
   0x3   :  { %15 = vsyncpa [#allocation4], 0 }
   0x4   :  { %17 = vsyncpa [#allocation4 + $0x1], 0  ;;  %s899_s21 = smov 0   ;;  %s901_s22 = smov 0  }
   0x5   :  { %s903_s23 = smov 0   ;;  %s905_s24 = smov 0  }
   0x6   :  { %s907_s25 = smov 0   ;;  %s909_s26 = smov 0  }
   0x7 LB: > { %s605_s27 = sadd.s32 4294967295, %s857_s26   ;;  %s606_s28 = sadd.s32 4294967294, %s857_s26   ;;  %s857_s26 = sphi %s909_s26, %s23_s26   ;;  %s853_s25 = sphi %s907_s25, %s1167_s25   ;;  %s849_s24 = sphi %s905_s24, %s1166_s24   ;;  %s845_s23 = sphi %s903_s23, %s1165_s23   ;;  %s841_s22 = sphi %s901_s22, %s1164_s22   ;;  %s837_s21 = sphi %s899_s21, %s1163_s21  }
   0x8   : > { %p57_p0 = scmp.ne.s32.totalorder %s841_s22, %s837_s21  ;;  %p933_p1 = scmp.eq.s32.totalorder %s605_s27, 0 }
   0x9   : > { %p937_p2 = scmp.eq.s32.totalorder %s605_s27, 1  ;;  %p199_p3 = scmp.eq.s32.totalorder %s606_s28, 1 }
   0xa   : > { %s1147_s29 = scalar_select %p933_p1, 1, 0 }
   0xb   : > { %s1148_s30 = scalar_select %p937_p2, 1, 0 }
   0xc   : > { %p943_p4 = por %p933_p1, %p57_p0  ;;  %p607_p5 = scmp.ge.s32.totalorder %s857_s26, 1 }
   0xd   : > { %p948_p6 = por %p199_p3, %p57_p0  ;;  %p206_p7 = scmp.lt.s32.totalorder %s857_s26, 3 }
   0xe   : > { %s1149_s7 = scalar_select %p943_p4, 1, 0 }
   0xf   : > { %s1150_s8 = scalar_select %p948_p6, 1, 0 }
  0x10   : > { %p953_p8 = pnand %p607_p5, %p206_p7  ;;  %s859_s10 = smov [#allocation5]  }
  0x11   : > { %s219_s11 = sshll.u32 %s859_s10, 4  ;;  %s35_s13 = sadd.s32 1, %s853_s25  ;;  %s220_s11 = int_to_ptr.vmem [resolvable:$true] %s219_s11 }
  0x12   : > { %s1151_s9 = scalar_select %p953_p8, 1, 0 }
  0x13   : > { %p644_p10 = pneg %p953_p8  ;;  %s44_s14 = sadd.s32 1, %s845_s23 }
  0x14   : > { %p968_p12 = scmp.ge.s32.totalorder %s35_s13, 2  ;;  %s713_s18 = scalar_lea.hbm %s1138_s2, 128 }
  0x15   : > { %p962_p11 = pnand %p644_p10, %p933_p1  ;;  %p714_p13 = scmp.ne.s32.totalorder %s1138_s2, %s713_s18 }
  0x16   : > { %s1153_s15 = scalar_select %p968_p12, 1, 0 }
  0x17   : > { %p715_p0 = pneg %p962_p11  ;;  %p720_p7 = scmp.lt.u32.totalorder %s713_s18, %s1138_s2 }
  0x19   : > { %p716_p3 = pnand %p715_p0, %p714_p13 }
  0x1b   : > { %p717_p5 = pneg %p716_p3 }
  0x1d   : > { %p722_p10 = pnand %p720_p7, %p717_p5 }
  0x1f   : > { %725 = shalt.err (!%p722_p10)
}
  0x20   : > { %s726_s10 = scalar_lea.vmem %s220_s11, 128  ;;  %p734_p4 = scmp.lt.s32.totalorder %s220_s11, %s220_s11 }
  0x21   : > { %p727_p9 = scmp.ne.s32.totalorder %s220_s11, %s726_s10  ;;  %p735_p8 = scmp.lt.s32.totalorder %s726_s10, %s726_s10 }
  0x23   : > { %p729_p6 = pnand %p727_p9, %p715_p0  ;;  %p736_p2 = por %p735_p8, %p734_p4 }
  0x25   : > { %p730_p1 = pneg %p729_p6 }
  0x27   : > { %p737_p12 = pnand %p736_p2, %p730_p1 }
  0x29   : > { %740 = shalt.err (!%p737_p12)
}
  0x2a   : > { %647 = dma.hbm_to_vmem [thread:$0]  (!%p962_p11), %s1138_s2, 128, %s220_s11, [#allocation6]  }
  0x2b   : > { %p1154_p4 = scmp.ne.s32.totalorder %s1153_s15, 0  ;;  %p51_p1 = scmp.ne.s32.totalorder %s845_s23, %s841_s22 }
  0x2c   : > { %p52_p2 = scmp.eq.s32.totalorder %s857_s26, 0  ;;  %p657_p6 = scmp.lt.s32.totalorder %s857_s26, 2 }
  0x2d   : > { %s1169_s13 = smov (%p1154_p4, %s35_s13), 0  ;;  %p1155_p12 = scmp.ne.s32.totalorder %s1148_s30, 0 }
  0x2e   : > { %s39_s12 = ssub.s32 %s853_s25, %s1169_s13  ;;  %p53_p9 = por %p52_p2, %p51_p1 }
  0x2f   : > { %p42_p8 = scmp.eq.s32.totalorder %s39_s12, 0  ;;  %p1000_p13 = por %p1155_p12, %p51_p1 }
  0x30   : > { %s239_s19 = sand.u32 1, %s845_s23   ;;  %s611_s15 = sshll.u32 %s853_s25, 7 }
  0x31   : > { %s1008_s20 = scalar_select %p42_p8, %s845_s23, %s44_s14  }
  0x32   : > { %s610_s11 = sshll.u32 %s239_s19, 3  ;;  %s1014_s10 = scalar_lea.hbm %s1136_s0, %s611_s15 }
  0x33   : > { %s243_s30 = scalar_lea.vmem [#allocation2], %s610_s11  ;;  %p1018_p11 = pnand %p657_p6, %p53_p9 }
  0x34   : > { %s251_s16 = sshll.u32 %s243_s30, 4  ;;  %s240_s14 = scalar_lea.sflag [#allocation3], %s239_s19  ;;  %s1016_s16 = int_to_ptr.vmem [resolvable:$true] %s251_s16 }
  0x35   : > { %s741_s12 = scalar_lea.hbm %s1014_s10, 128  ;;  %p743_p3 = pneg %p1018_p11 }
  0x36   : > { %p742_p0 = scmp.ne.s32.totalorder %s1014_s10, %s741_s12  ;;  %s746_s27 = scalar_lea.hbm %s1136_s0, 256 }
  0x37   : > { %p747_p10 = scmp.lt.u32.totalorder %s1014_s10, %s1136_s0  ;;  %p748_p4 = scmp.lt.u32.totalorder %s746_s27, %s741_s12 }
  0x38   : > { %p744_p5 = pnand %p743_p3, %p742_p0  ;;  %p750_p2 = scmp.lt.u32.totalorder %s741_s12, %s1014_s10 }
  0x39   : > { %p749_p1 = por %p748_p4, %p747_p10 }
  0x3a   : > { %p745_p7 = pneg %p744_p5 }
  0x3b   : > { %p751_p6 = por %p750_p2, %p749_p1 }
  0x3d   : > { %p752_p8 = pnand %p751_p6, %p745_p7 }
  0x3f   : > { %755 = shalt.err (!%p752_p8)
}
  0x40   : > { %s756_s19 = scalar_lea.vmem %s1016_s16, 128  ;;  %s860_s15 = smov [#allocation2]  }
  0x41   : > { %p757_p9 = scmp.ne.s32.totalorder %s1016_s16, %s756_s19  ;;  %s761_s11 = sshll.u32 %s860_s15, 4  ;;  %s762_s11 = int_to_ptr.vmem [resolvable:$false] %s761_s11 }
  0x42   : > { %s763_s28 = scalar_lea.vmem %s762_s11, 256  ;;  %p764_p5 = scmp.lt.s32.totalorder %s1016_s16, %s762_s11 }
  0x43   : > { %p759_p12 = pnand %p757_p9, %p743_p3  ;;  %p765_p10 = scmp.lt.s32.totalorder %s763_s28, %s756_s19 }
  0x45   : > { %p760_p0 = pneg %p759_p12  ;;  %p766_p4 = por %p765_p10, %p764_p5 }
  0x47   : > { %p767_p1 = pnand %p766_p4, %p760_p0 }
  0x49   : > { %770 = shalt.err (!%p767_p1)
}
  0x4a   : > { %651 = dma.hbm_to_vmem [thread:$0]  (!%p1018_p11), %s1014_s10, 128, %s1016_s16, %s240_s14  }
  0x4b   : > { %p1158_p7 = scmp.ne.s32.totalorder %s1151_s9, 0 }
  0x4c   : > { %s1050_s12 = sand.u32 (!%p1158_p7), 1, %s841_s22   ;;  %p1159_p3 = scmp.ne.s32.totalorder (!%p1158_p7), %s1149_s7, 0 }
  0x4d   : > { %266 = sbr.rel (%p1158_p7) target bundleno = 328 (0x148), region = 44  ;;  %s613_s27 = sshll.u32 (!%p1158_p7), %s1050_s12, 3 }
  0x4e   : > { %s269_s30 = scalar_lea.sflag (!%p1158_p7), [#allocation3], %s1050_s12  ;;  %s272_s19 = scalar_lea.vmem (!%p1158_p7), [#allocation2], %s613_s27 }
  0x54   : > { %824 = dma.done.wait (%p1159_p3), %s269_s30, 128  }
  0x55   : > { %826 = vsyncadd (%p1159_p3), %s269_s30, 4294967168  ;;  %p1160_p11 = scmp.ne.s32.totalorder %s1147_s29, 0 }
  0x57   : > { %828 = dma.done.wait (%p1160_p11), [#allocation6], 128  }
  0x58   : > { %830 = vsyncadd (%p1160_p11), [#allocation6], 4294967168  ;;  %p308_p2 = scmp.lt.s32.totalorder %s849_s24, 1  ;;  %v861_v0 = vmov 0.0   ;;  %vm862_vm0 = vmmov 0   ;;  %vm313_vm1 = vcmask 64512   ;;  %v480_v16 = vlaneseq }
  0x59   : > { %626 = vmatprep.subr.mxu0 %v861_v0  ;;  %628 = vmatprep.mubr.msk.f32.mxu0 %vm862_vm0, %v861_v0  ;;  %vm463_vm2 = vcmask 261120   ;;  %v312_v1 = vld [vmem:[#allocation5] sm:$0xff]  ;;  %v389_v3 = vld [vmem:[%s1140_s4] sm:$0xff]  ;;  %s619_s30 = sshll.u32 %s849_s24, 7  ;;  %s492_s29 = scalar_lea.sflag [#allocation4], %s1050_s12 }
  0x5a   : > { %631 = vmatprep.subr.mxu1 %v861_v0  ;;  %s309_s9 = scalar_select %p308_p2, %s849_s24, 1  ;;  %633 = vmatprep.mubr.msk.f32.mxu1 %vm862_vm0, %v861_v0  ;;  %v462_v4 = vld [vmem:[%s272_s19] sm:$0xff]  ;;  %v481_v17 = vshrl.u32 %v480_v16, 7 }
  0x5b   : > { %627 = vmatpush3.msra.mxu0 %v312_v1  ;;  %632 = vmatpush3.msra.mxu1 %v389_v3  ;;  %v464_v5 = vsel %vm463_vm2, %v462_v4, 0.0  ;;  %v468_v6 = vmul.f32 %v462_v4, %v462_v4  ;;  %v387_v18 = vld [vmem:[%s1139_s3] sm:$0x1]  ;;  %s307_s19 = scalar_lea.vmem [#allocation7], %s613_s27  ;;  %s863_s24 = smov [#allocation7]  }
  0x5c   : > { %s310_s7 = scalar_lea.vmem %s1137_s1, %s309_s9  ;;  %465 = vadd.xlane.f32.xlu0 %v464_v5  ;;  %v460_v19 = vld [vmem:[%s1141_s5] sm:$0x1]  ;;  %v482_v21 = vsub.s32 0, %v481_v17  ;;  %s506_s9 = sshll.u32 %s307_s19, 4  ;;  %s1088_s9 = int_to_ptr.vmem [resolvable:$true] %s506_s9 }
  0x5d   : > { %v311_v2 = vld [vmem:[%s310_s7] sm:$0x1]  ;;  %v469_v7 = vsel %vm463_vm2, %v468_v6, 0.0  ;;  %s1086_s7 = scalar_lea.hbm %s1142_s6, %s619_s30  ;;  %s771_s17 = scalar_lea.vmem %s1088_s9, 128 }
  0x5e   : > { %629 = vmatmul.mubr.msk.f32.vlgmr.msra.gmra.mrb[0].mxu0 %vm313_vm1, %v311_v2  ;;  %634 = vmatmul.mubr.msk.f32.vlgmr.msra.gmra.mrb[0].mxu1 %vm313_vm1, %v311_v2  ;;  %p772_p6 = scmp.ne.s32.totalorder %s1088_s9, %s771_s17  ;;  %s775_s27 = sshll.u32 %s863_s24, 4  ;;  %s776_s27 = int_to_ptr.vmem [resolvable:$false] %s775_s27 }
  0x5f   : > { %s777_s14 = scalar_lea.vmem %s776_s27, 256  ;;  %p778_p12 = scmp.lt.s32.totalorder %s1088_s9, %s776_s27 }
  0x60   : > { %470 = vadd.xlane.f32.xlu0 %v469_v7  ;;  %p773_p8 = pnand %p772_p6, %p1000_p13  ;;  %p779_p0 = scmp.lt.s32.totalorder %s777_s14, %s771_s17 }
  0x62   : > { %p774_p9 = pneg %p773_p8  ;;  %p780_p5 = por %p779_p0, %p778_p12 }
  0x64   : > { %p781_p10 = pnand %p780_p5, %p774_p9 }
  0xe9   : > { %v466_v8 = vpop.xlane.xlu0 %465 }
  0xea   : > { %v467_v9 = vmul.f32 0.03125, %v466_v8 }
  0xec   : > { %v473_v11 = vmul.f32 %v467_v9, %v467_v9  ;;  %v476_v20 = vsub.f32 %v462_v4, %v467_v9 }
  0xed   : > { %v471_v10 = vpop.xlane.xlu0 %470 }
  0xee   : > { %v472_v12 = vmul.f32 0.03125, %v471_v10 }
  0xf0   : > { %v474_v13 = vsub.f32 %v472_v12, %v473_v11 }
  0xf2   : > { %v475_v14 = vmax.f32 %v474_v13, 0.0 }
  0xf4   : > { %v477_v15 = vadd.f32 1e-05, %v475_v14 }
  0xf6   : > { %711 = vrsqrt.f32 %v477_v15 }
 0x100   : > { %v712_v22 = vpop.eup %711 }
 0x101   : > { %v479_v29 = vmul.f32 %v712_v22, %v476_v20 }
 0x131   : > { %v383_v23 = vpop.f32.mrb[0].mxu0  ;;  %v456_v24 = vpop.f32.mrb[0].mxu1 }
 0x132   : > { %v388_v25 = vadd.f32 %v387_v18, %v383_v23  ;;  %v630_v26 = vpop.f32.mrb[1].mxu0  ;;  %v461_v27 = vadd.f32 %v460_v19, %v456_v24  ;;  %v635_v28 = vpop.f32.mrb[1].mxu1 }
 0x134   : > { %v483_v30 = vrot.slane %v388_v25, %v482_v21  ;;  %v488_v31 = vrot.slane %v461_v27, %v482_v21 }
 0x136   : > { %v484_v32 = vmul.f32 %v483_v30, %v479_v29 }
 0x138   : > { %v489_v33 = vadd.f32 %v488_v31, %v484_v32 }
 0x13a   : > { %490 = vst.msk [vmem:[%s307_s19] sm:$0xff] %vm463_vm2, %v489_v33 }
 0x13b   : > { %784 = shalt.err (!%p781_p10)
}
 0x13c   : > { %s785_s12 = scalar_lea.hbm %s1086_s7, 128  ;;  %s789_s28 = scalar_lea.hbm %s1142_s6, 256 }
 0x13d   : > { %p786_p4 = scmp.ne.s32.totalorder %s1086_s7, %s785_s12  ;;  %p790_p3 = scmp.lt.u32.totalorder %s1086_s7, %s1142_s6 }
 0x13e   : > { %p791_p11 = scmp.lt.u32.totalorder %s789_s28, %s785_s12  ;;  %p793_p6 = scmp.lt.u32.totalorder %s785_s12, %s1086_s7 }
 0x13f   : > { %p787_p1 = pnand %p786_p4, %p1000_p13 }
 0x140   : > { %p792_p2 = por %p791_p11, %p790_p3 }
 0x141   : > { %p788_p7 = pneg %p787_p1 }
 0x142   : > { %p794_p8 = por %p793_p6, %p792_p2 }
 0x144   : > { %p795_p9 = pnand %p794_p8, %p788_p7 }
 0x146   : > { %798 = shalt.err (!%p795_p9)
}
 0x147   : > { %642 = dma.vmem_to_hbm [thread:$0]  (%p1000_p13), %s1088_s9, 128, %s1086_s7, %s492_s29  }
 0x148 PF: > { %s518_s10 = sand.u32 1, %s837_s21   ;;  %p1161_p12 = scmp.ne.s32.totalorder %s1150_s8, 0 }
 0x149   : > { %p1162_p0 = scmp.ge.s32.totalorder %s857_s26, 2  ;;  %s519_s16 = scalar_lea.sflag [#allocation4], %s518_s10 }
 0x14b   : > { %p653_p5 = pnand %p1162_p0, %p1161_p12 }
 0x14d   : > { %832 = dma.done.wait (!%p653_p5), %s519_s16, 128  }
 0x14e   : > { %834 = vsyncadd (!%p653_p5), %s519_s16, 4294967168  ;;  %s23_s26 = sadd.s32 1, %s857_s26   ;;  %s1163_s21 = smov %s841_s22 }
 0x14f   : > { %p20_p10 = scmp.ge.s32.totalorder %s23_s26, 4   ;;  %s1164_s22 = smov %s845_s23 }
 0x150   : > { %s1165_s23 = smov %s1008_s20  ;;  %s1166_s24 = smov %s853_s25 }
 0x151   : > { %s1167_s25 = smov %s1169_s13  ;;  %22 = sbr.rel (!%p20_p10) target bundleno = 7 (0x7), region = 96 }
 0x158   :  { %524 = vsyncpa [#allocation3], 1 }
 0x159   :  { %526 = vsyncpa [#allocation3 + $0x1], 1 }
 0x15a   :  { %527 = vsyncpa [#allocation6], 1 }
 0x15b   :  { %528 = vsyncpa [#allocation4], 1 }
 0x15c   :  { %530 = vsyncpa [#allocation4 + $0x1], 1 }

</bundles_post_ra>
